<compile_context>
chip_gen: v5e
topology: v5e:2x2
jax: 0.10.0
libtpu: 0.0.40
codegen_flags: <defaults>
</compile_context>

<pallas_src>
import jax
import jax.numpy as jnp
from jax.experimental import pallas as pl
from jax.experimental.pallas import tpu as pltpu


def _round_up(n: int, m: int) -> int:
    return ((n + m - 1) // m) * m


def simple_nn_kernel(x_ref, w1_ref, b1_ref, w2_ref, b2_ref, noise_ref, out_ref):
    # Layer 1 on the MXU: contract the D axes of W1^T (H, D) and x (tb, D) -> (H, tb),
    # i.e. the activation is produced directly lane-dense over the batch (no transpose,
    # no operand cast; f32 + HIGHEST precision is free at this size and matches f32 ref).
    h = jax.lax.dot_general(
        w1_ref[...], x_ref[...],
        dimension_numbers=(((1,), (1,)), ((), ())),
        preferred_element_type=jnp.float32,
        precision=jax.lax.Precision.HIGHEST,
    )
    h = jnp.maximum(h + b1_ref[...], 0.0)                 # f32 bias + ReLU (VPU)

    # Layer 2: VPU multiply + cross-sublane (XLU) reduce -> lane-dense (1, tb) row
    # (a (*, 1) MXU matmul would leave the systolic array >99% idle for no benefit).
    o = jnp.sum(h * w2_ref[...], axis=0, keepdims=True)

    # Fused epilogue: SMEM scalar bias + 0.1 * noise, one unmasked lane-dense store.
    out_ref[...] = o + (noise_ref[...] * 0.1 + b2_ref[0, 0])


def simple_nn_forward(x, w1, b1, w2, b2, noise, *, block_b=8192):
    """x: (B, D); w1: (D, H); b1: (1, H); w2: (H, 1); b2: (1, 1); noise: (B, 1)."""
    B, D = x.shape
    H = w1.shape[1]

    x_f = jnp.asarray(x, jnp.float32)                        # streamed in native layout
    w1_t = jnp.asarray(w1, jnp.float32).T                    # (H, D)  resident
    b1_c = jnp.asarray(b1, jnp.float32).reshape(H, 1)        # (H, 1)  resident
    w2_c = jnp.asarray(w2, jnp.float32).reshape(H, 1)        # (H, 1)  resident
    b2_s = jnp.asarray(b2, jnp.float32).reshape(1, 1)        # (1, 1)  SMEM scalar
    noise_row = jnp.asarray(noise, jnp.float32).reshape(1, B)  # contiguous reshape (free)

    # ---- batch tiling ------------------------------------------------------
    # Large 128-lane-aligned tile (amortizes per-grid-step overhead); keep >= 2 grid
    # steps when the batch allows it (v7x 2-TC sharding); zero-pad B to a tile multiple
    # so we never collapse to a single whole-batch block.
    n_blocks = max(1, -(-B // block_b))                      # ceil(B / block_b)
    if B > 128:
        n_blocks = max(n_blocks, 2)
    tb = _round_up(-(-B // n_blocks), 128)
    bp = _round_up(B, tb)
    grid = (bp // tb,)

    if bp != B:
        x_f = jnp.pad(x_f, ((0, bp - B), (0, 0)))
        noise_row = jnp.pad(noise_row, ((0, 0), (0, bp - B)))

    out_row = pl.pallas_call(
        simple_nn_kernel,
        out_shape=jax.ShapeDtypeStruct((1, bp), jnp.float32),
        grid=grid,
        in_specs=[
            pl.BlockSpec((tb, D), lambda i: (i, 0)),             # x     (streamed, native)
            pl.BlockSpec((H, D), lambda i: (0, 0)),              # W1^T  (resident)
            pl.BlockSpec((H, 1), lambda i: (0, 0)),              # b1    (resident)
            pl.BlockSpec((H, 1), lambda i: (0, 0)),              # w2    (resident)
            pl.BlockSpec(memory_space=pltpu.MemorySpace.SMEM),   # b2 scalar in SMEM
            pl.BlockSpec((1, tb), lambda i: (0, i)),             # noise row (streamed)
        ],
        out_specs=pl.BlockSpec((1, tb), lambda i: (0, i)),       # lane-dense output row
        compiler_params=pltpu.CompilerParams(
            dimension_semantics=("parallel",),                   # v7x 2 TCs; neutral v5e/v6e
        ),
    )(x_f, w1_t, b1_c, w2_c, b2_s, noise_row)

    return out_row[:, :B].reshape(B, 1)


def make_params(key, input_size):
    """nn.Linear-shaped params: Linear(input_size, hidden), Linear(hidden, 1),
       hidden = max(input_size // 2, 4); torch-default uniform init."""
    hidden_size = max(input_size // 2, 4)
    k1, k2, k3, k4 = jax.random.split(key, 4)
    lim1 = 1.0 / jnp.sqrt(jnp.float32(input_size))
    lim2 = 1.0 / jnp.sqrt(jnp.float32(hidden_size))
    w1 = jax.random.uniform(k1, (input_size, hidden_size), jnp.float32, -lim1, lim1)
    b1 = jax.random.uniform(k2, (1, hidden_size), jnp.float32, -lim1, lim1)
    w2 = jax.random.uniform(k3, (hidden_size, 1), jnp.float32, -lim2, lim2)
    b2 = jax.random.uniform(k4, (1, 1), jnp.float32, -lim2, lim2)
    return w1, b1, w2, b2


def _reference(x, w1, b1, w2, b2, noise):
    h = jnp.maximum(jnp.dot(x, w1, precision=jax.lax.Precision.HIGHEST) + b1, 0.0)
    o = jnp.sum(h * w2.reshape(1, -1), axis=-1, keepdims=True)   # exact f32 layer 2
    return o + b2 + noise * 0.1


if __name__ == "__main__":
    key = jax.random.PRNGKey(0)
    k_params, k_x, k_noise = jax.random.split(key, 3)

    batch = 8
    input_size = 16                       # hidden_size = max(16 // 2, 4) = 8

    w1, b1, w2, b2 = make_params(k_params, input_size)
    x = jax.random.normal(k_x, (batch, input_size), jnp.float32)
    noise = jax.random.normal(k_noise, (batch, 1), jnp.float32)   # torch.randn_like(o)

    out = simple_nn_forward(x, w1, b1, w2, b2, noise)
    jax.block_until_ready(out)
    assert out.shape == (batch, 1)

    ref = _reference(x, w1, b1, w2, b2, noise)
    assert jnp.allclose(out, ref, atol=1e-4, rtol=1e-4), float(jnp.max(jnp.abs(out - ref)))

    # Robustness check: non-multiple-of-tile batch -> padded, multi-step ("parallel") grid.
    batch2 = 1000
    x2 = jax.random.normal(jax.random.PRNGKey(1), (batch2, input_size), jnp.float32)
    n2 = jax.random.normal(jax.random.PRNGKey(2), (batch2, 1), jnp.float32)
    out2 = simple_nn_forward(x2, w1, b1, w2, b2, n2)
    jax.block_until_ready(out2)
    ref2 = _reference(x2, w1, b1, w2, b2, n2)
    assert out2.shape == (batch2, 1)
    assert jnp.allclose(out2, ref2, atol=1e-4, rtol=1e-4), float(jnp.max(jnp.abs(out2 - ref2)))

    print("KERNEL_OK")
</pallas_src>

<mosaic_0001>
module attributes {stable_mosaic.version = 11 : i64} {
  func.func @simple_nn_kernel(%arg0: i32, %arg1: memref<128x16xf32, #tpu.memory_space<vmem>>, %arg2: memref<8x16xf32, #tpu.memory_space<vmem>>, %arg3: memref<8x1xf32, #tpu.memory_space<vmem>>, %arg4: memref<8x1xf32, #tpu.memory_space<vmem>>, %arg5: memref<1x1xf32, #tpu.memory_space<smem>>, %arg6: memref<1x128xf32, #tpu.memory_space<vmem>>, %arg7: memref<1x128xf32, #tpu.memory_space<vmem>>) attributes {dimension_semantics = [#tpu.dimension_semantics<parallel>], iteration_bounds = array<i64: 1>, scalar_prefetch = 0 : i64, scratch_operands = 0 : i64, tpu.core_type = #tpu.core_type<tc>, window_params = [{transform_indices = @transform_0, window_bounds = array<i64: 128, 16>}, {pipeline_mode = #tpu.pipeline_mode<synchronous>, transform_indices = @transform_1, window_bounds = array<i64: 8, 16>}, {pipeline_mode = #tpu.pipeline_mode<synchronous>, transform_indices = @transform_2, window_bounds = array<i64: 8, 1>}, {pipeline_mode = #tpu.pipeline_mode<synchronous>, transform_indices = @transform_3, window_bounds = array<i64: 8, 1>}, {transform_indices = @transform_4, window_bounds = array<i64: 1, 1>}, {transform_indices = @transform_5, window_bounds = array<i64: 1, 128>}, {transform_indices = @transform_6, window_bounds = array<i64: 1, 128>}]} {
    %c0 = arith.constant 0 : index
    %c0_0 = arith.constant 0 : index
    %0 = vector.load %arg2[%c0, %c0_0] : memref<8x16xf32, #tpu.memory_space<vmem>>, vector<8x16xf32>
    %c0_1 = arith.constant 0 : index
    %c0_2 = arith.constant 0 : index
    %1 = vector.load %arg1[%c0_1, %c0_2] : memref<128x16xf32, #tpu.memory_space<vmem>>, vector<128x16xf32>
    %cst = arith.constant dense<0.000000e+00> : vector<8x128xf32>
    %2 = tpu.matmul %0, %1, %cst {dimension_numbers = #tpu.dot_dimension_numbers<[1], [1], [0], [0], [0, 0, 1, 0], [], []>, precision = #tpu.contract_precision<fp32>} : vector<8x16xf32>, vector<128x16xf32>, vector<8x128xf32> -> vector<8x128xf32>
    %c0_3 = arith.constant 0 : index
    %c0_4 = arith.constant 0 : index
    %3 = vector.load %arg3[%c0_3, %c0_4] : memref<8x1xf32, #tpu.memory_space<vmem>>, vector<8x1xf32>
    %4 = vector.broadcast %3 : vector<8x1xf32> to vector<8x128xf32>
    %5 = arith.addf %2, %4 : vector<8x128xf32>
    %cst_5 = arith.constant 0.000000e+00 : f32
    %6 = vector.broadcast %cst_5 : f32 to vector<8x128xf32>
    %7 = arith.maximumf %5, %6 : vector<8x128xf32>
    %c0_6 = arith.constant 0 : index
    %c0_7 = arith.constant 0 : index
    %8 = vector.load %arg4[%c0_6, %c0_7] : memref<8x1xf32, #tpu.memory_space<vmem>>, vector<8x1xf32>
    %9 = vector.broadcast %8 : vector<8x1xf32> to vector<8x128xf32>
    %10 = arith.mulf %7, %9 : vector<8x128xf32>
    %cst_8 = arith.constant dense<0.000000e+00> : vector<128xf32>
    %11 = vector.multi_reduction <add>, %10, %cst_8 [0] : vector<8x128xf32> to vector<128xf32>
    %12 = vector.shape_cast %11 : vector<128xf32> to vector<1x128xf32>
    %c0_9 = arith.constant 0 : index
    %c0_10 = arith.constant 0 : index
    %13 = vector.load %arg6[%c0_9, %c0_10] : memref<1x128xf32, #tpu.memory_space<vmem>>, vector<1x128xf32>
    %cst_11 = arith.constant 1.000000e-01 : f32
    %14 = vector.broadcast %cst_11 : f32 to vector<1x128xf32>
    %15 = arith.mulf %13, %14 : vector<1x128xf32>
    %c0_12 = arith.constant 0 : index
    %c0_13 = arith.constant 0 : index
    %16 = memref.load %arg5[%c0_12, %c0_13] : memref<1x1xf32, #tpu.memory_space<smem>>
    %17 = vector.broadcast %16 : f32 to vector<1x128xf32>
    %18 = arith.addf %15, %17 : vector<1x128xf32>
    %19 = arith.addf %12, %18 : vector<1x128xf32>
    %c0_14 = arith.constant 0 : index
    %c0_15 = arith.constant 0 : index
    %20 = vector.load %arg7[%c0_14, %c0_15] : memref<1x128xf32, #tpu.memory_space<vmem>>, vector<1x128xf32>
    tpu.vector_store %arg7[%c0_14, %c0_15], %19 {strides = array<i32>} : memref<1x128xf32, #tpu.memory_space<vmem>>, vector<1x128xf32>,
    return
  }
  func.func @transform_0(%arg0: i32) -> (i32, i32) {
    %c0_i32 = arith.constant 0 : i32
    %c0_i32_0 = arith.constant 0 : i32
    return %arg0, %c0_i32 : i32, i32
  }
  func.func @transform_1(%arg0: i32) -> (i32, i32) {
    %c0_i32 = arith.constant 0 : i32
    %c0_i32_0 = arith.constant 0 : i32
    %c0_i32_1 = arith.constant 0 : i32
    return %c0_i32, %c0_i32_0 : i32, i32
  }
  func.func @transform_2(%arg0: i32) -> (i32, i32) {
    %c0_i32 = arith.constant 0 : i32
    %c0_i32_0 = arith.constant 0 : i32
    %c0_i32_1 = arith.constant 0 : i32
    return %c0_i32, %c0_i32_0 : i32, i32
  }
  func.func @transform_3(%arg0: i32) -> (i32, i32) {
    %c0_i32 = arith.constant 0 : i32
    %c0_i32_0 = arith.constant 0 : i32
    %c0_i32_1 = arith.constant 0 : i32
    return %c0_i32, %c0_i32_0 : i32, i32
  }
  func.func @transform_4(%arg0: i32) -> (i32, i32) {
    %c0_i32 = arith.constant 0 : i32
    %c0_i32_0 = arith.constant 0 : i32
    %c0_i32_1 = arith.constant 0 : i32
    return %c0_i32, %c0_i32_0 : i32, i32
  }
  func.func @transform_5(%arg0: i32) -> (i32, i32) {
    %c0_i32 = arith.constant 0 : i32
    %c0_i32_0 = arith.constant 0 : i32
    return %c0_i32, %arg0 : i32, i32
  }
  func.func @transform_6(%arg0: i32) -> (i32, i32) {
    %c0_i32 = arith.constant 0 : i32
    %c0_i32_0 = arith.constant 0 : i32
    return %c0_i32, %arg0 : i32, i32
  }
}

</mosaic_0001>

<bundles_post_ra>
// kernel: tpu_custom_call.1
= control target key start
LH: loop header
LB: loop body
LE: loop exit
PB: predicated region body
PF: predicated region fallthrough
CT: control target
= control target key end

     0   :  { %vm48_vm0 = vcmask 130048   ;;  %s863_s0 = inlined_call_operand.vmem [shape: f32[128,16], index: 0, kind: input, shape index: {}]   ;;  %s864_s1 = inlined_call_operand.vmem [shape: f32[8,16], index: 1, kind: input, shape index: {}]   ;;  %s865_s2 = inlined_call_operand.vmem [shape: f32[8,1], index: 2, kind: input, shape index: {}]   ;;  %s866_s3 = inlined_call_operand.vmem [shape: f32[8,1], index: 3, kind: input, shape index: {}]   ;;  %s867_s4 = inlined_call_operand.<no memory space> [shape: f32[1,1], index: 4, kind: input, shape index: {}]   ;;  %s868_s5 = inlined_call_operand.vmem [shape: f32[1,128], index: 5, kind: input, shape index: {}]   ;;  %s869_s6 = inlined_call_operand.hbm [shape: f32[1,128], index: 6, kind: output, shape index: {}]  }
   0x1   :  { %v41_v0 = vld [vmem:[%s863_s0 + $0x78] sm:$0xff]  ;;  %v40_v1 = vld [vmem:[%s863_s0 + $0x70] sm:$0xff]  ;;  %v39_v2 = vld [vmem:[%s863_s0 + $0x68] sm:$0xff] }
   0x2   :  { %v98_v3 = vsel %vm48_vm0, %v41_v0, 0  ;;  %v95_v4 = vsel %vm48_vm0, %v40_v1, 0  ;;  %v92_v5 = vsel %vm48_vm0, %v39_v2, 0  ;;  %v38_v6 = vld [vmem:[%s863_s0 + $0x60] sm:$0xff]  ;;  %v37_v7 = vld [vmem:[%s863_s0 + $0x58] sm:$0xff]  ;;  %v36_v17 = vld [vmem:[%s863_s0 + $0x50] sm:$0xff] }
   0x3   :  { %v562_v8 = vand.u32 4294901760, %v98_v3  ;;  %v564_v9 = vand.u32 4294901760, %v95_v4  ;;  %v566_v10 = vand.u32 4294901760, %v92_v5  ;;  %v89_v11 = vsel %vm48_vm0, %v38_v6, 0 }
   0x4   :  { %v569_v12 = vand.u32 4294901760, %v89_v11  ;;  %v86_v16 = vsel %vm48_vm0, %v37_v7, 0 }
   0x5   :  { %101 = vmatpush.xpose.msra.mxu0 %v562_v8  ;;  %v573_v13 = vsub.f32 %v98_v3, %v562_v8  ;;  %v576_v14 = vsub.f32 %v95_v4, %v564_v9  ;;  %v579_v15 = vsub.f32 %v92_v5, %v566_v10  ;;  %297 = vmatpush.xpose.msra.mxu3 %v562_v8 }
   0x6   :  { %12 = vsyncpa [#allocation4], 0  ;;  %v589_v20 = vand.u32 4294901760, %v86_v16  ;;  %v83_v21 = vsel %vm48_vm0, %v36_v17, 0  ;;  %v601_v25 = vsub.f32 %v89_v11, %v569_v12  ;;  %v35_v26 = vld [vmem:[%s863_s0 + $0x48] sm:$0xff]  ;;  %v34_v34 = vld [vmem:[%s863_s0 + $0x40] sm:$0xff] }
   0x7   :  { %v143_v18 = vand.u32 4294901760, %v573_v13  ;;  %v149_v19 = vand.u32 4294901760, %v576_v14  ;;  %244 = vmatpush.xpose.msra.mxu2 %v573_v13  ;;  %v155_v24 = vand.u32 4294901760, %v579_v15  ;;  %v608_v28 = vand.u32 4294901760, %v83_v21  ;;  %v33_v41 = vld [vmem:[%s863_s0 + $0x38] sm:$0xff]  ;;  %v32_v48 = vld [vmem:[%s863_s0 + $0x30] sm:$0xff] }
   0x8   :  { %v80_v29 = vsel %vm48_vm0, %v35_v26, 0  ;;  %v161_v32 = vand.u32 4294901760, %v601_v25  ;;  %v617_v33 = vsub.f32 %v86_v16, %v589_v20  ;;  %v77_v36 = vsel %vm48_vm0, %v34_v34, 0  ;;  %v31_v55 = vld [vmem:[%s863_s0 + $0x28] sm:$0xff]  ;;  %v30_v62 = vld [vmem:[%s863_s0 + $0x20] sm:$0xff]  ;;  %v29_v5 = vld [vmem:[%s863_s0 + $0x18] sm:$0xff] }
   0x9   :  { %v144_v22 = vsub.f32 %v573_v13, %v143_v18  ;;  %103 = vmatpush.xpose.msra.mxu0 %v564_v9  ;;  %v150_v23 = vsub.f32 %v576_v14, %v149_v19  ;;  %299 = vmatpush.xpose.msra.mxu3 %v564_v9  ;;  %v156_v31 = vsub.f32 %v579_v15, %v155_v24  ;;  %v624_v35 = vand.u32 4294901760, %v80_v29  ;;  %v27_v34 = vld [vmem:[%s863_s0 + $0x8] sm:$0xff]  ;;  %v25_v13 = vld [vmem:[%s864_s1] sm:$0xff]  ;;  %s508_s11 = smov [#allocation3]   ;;  %s469_s15 = sshll.u32 %s869_s6, 4  ;;  %s470_s15 = int_to_ptr.hbm [resolvable:$true] %s469_s15 }
   0xa   :  { %v162_v38 = vsub.f32 %v601_v25, %v161_v32  ;;  %v167_v39 = vand.u32 4294901760, %v617_v33  ;;  %v633_v40 = vsub.f32 %v83_v21, %v608_v28  ;;  %v643_v43 = vand.u32 4294901760, %v77_v36  ;;  %s467_s12 = sshll.u32 %s508_s11, 4  ;;  %s468_s12 = int_to_ptr.vmem [resolvable:$true] %s467_s12 }
   0xb   :  { %v145_v27 = vand.u32 4294901760, %v144_v22  ;;  %247 = vmatpush.xpose.msra.mxu2 %v576_v14  ;;  %v151_v30 = vand.u32 4294901760, %v150_v23  ;;  %v157_v37 = vand.u32 4294901760, %v156_v31  ;;  %v641_v42 = vsub.f32 %v80_v29, %v624_v35  ;;  %v28_v22 = vld [vmem:[%s863_s0 + $0x10] sm:$0xff] }
   0xc   :  { %v163_v44 = vand.u32 4294901760, %v162_v38  ;;  %v168_v45 = vsub.f32 %v617_v33, %v167_v39  ;;  %v173_v46 = vand.u32 4294901760, %v633_v40  ;;  %v74_v47 = vsel %vm48_vm0, %v33_v41, 0 }
   0xd   :  { %146 = vmatpush.xpose.msra.mxu1 %v145_v27  ;;  %105 = vmatpush.xpose.msra.mxu0 %v566_v10  ;;  %v179_v49 = vand.u32 4294901760, %v641_v42  ;;  %v658_v50 = vsub.f32 %v77_v36, %v643_v43  ;;  %v664_v53 = vand.u32 4294901760, %v74_v47  ;;  %v71_v54 = vsel %vm48_vm0, %v32_v48, 0 }
   0xe   :  { %301 = vmatpush.xpose.msra.mxu3 %v566_v10  ;;  %v169_v51 = vand.u32 4294901760, %v168_v45  ;;  %v174_v52 = vsub.f32 %v633_v40, %v173_v46  ;;  %v680_v60 = vand.u32 4294901760, %v71_v54  ;;  %v68_v61 = vsel %vm48_vm0, %v31_v55, 0 }
   0xf   :  { %250 = vmatpush.xpose.msra.mxu2 %v579_v15  ;;  %v180_v56 = vsub.f32 %v641_v42, %v179_v49  ;;  %v185_v57 = vand.u32 4294901760, %v658_v50  ;;  %v678_v59 = vsub.f32 %v74_v47, %v664_v53  ;;  %v696_v3 = vand.u32 4294901760, %v68_v61  ;;  %v26_v47 = vld [vmem:[%s863_s0] sm:$0xff] }
  0x10   :  { %v175_v58 = vand.u32 4294901760, %v174_v52  ;;  %v694_v2 = vsub.f32 %v71_v54, %v680_v60  ;;  %v65_v4 = vsel %vm48_vm0, %v30_v62, 0  ;;  %v62_v21 = vsel %vm48_vm0, %v29_v5, 0 }
  0x11   :  { %152 = vmatpush.xpose.msra.mxu1 %v151_v30  ;;  %107 = vmatpush.xpose.msra.mxu0 %v569_v12  ;;  %v181_v63 = vand.u32 4294901760, %v180_v56  ;;  %v186_v0 = vsub.f32 %v658_v50, %v185_v57  ;;  %v191_v1 = vand.u32 4294901760, %v678_v59  ;;  %v704_v6 = vand.u32 4294901760, %v65_v4 }
  0x12   :  { %303 = vmatpush.xpose.msra.mxu3 %v569_v12  ;;  %v197_v16 = vand.u32 4294901760, %v694_v2  ;;  %v712_v17 = vsub.f32 %v68_v61, %v696_v3  ;;  %v728_v30 = vand.u32 4294901760, %v62_v21  ;;  %v59_v31 = vsel %vm48_vm0, %v28_v22, 0 }
  0x13   :  { %253 = vmatpush.xpose.msra.mxu2 %v601_v25  ;;  %v187_v7 = vand.u32 4294901760, %v186_v0  ;;  %v192_v11 = vsub.f32 %v678_v59, %v191_v1  ;;  %v721_v23 = vsub.f32 %v65_v4, %v704_v6  ;;  %v56_v45 = vsel %vm48_vm0, %v27_v34, 0 }
  0x14   :  { %v198_v27 = vsub.f32 %v694_v2, %v197_v16  ;;  %v203_v29 = vand.u32 4294901760, %v712_v17  ;;  %v742_v41 = vsub.f32 %v62_v21, %v728_v30  ;;  %v760_v55 = vand.u32 4294901760, %v56_v45 }
  0x15   :  { %158 = vmatpush.xpose.msra.mxu1 %v157_v37  ;;  %109 = vmatpush.xpose.msra.mxu0 %v589_v20  ;;  %v193_v26 = vand.u32 4294901760, %v192_v11  ;;  %v209_v36 = vand.u32 4294901760, %v721_v23  ;;  %v53_v56 = vsel %vm48_vm0, %v26_v47, 0  ;;  %v50_v14 = vsel %vm48_vm0, %v25_v13, 0 }
  0x16   :  { %305 = vmatpush.xpose.msra.mxu3 %v589_v20  ;;  %v199_v37 = vand.u32 4294901760, %v198_v27  ;;  %v204_v38 = vsub.f32 %v712_v17, %v203_v29  ;;  %v215_v52 = vand.u32 4294901760, %v742_v41  ;;  %v773_v0 = vand.u32 4294901760, %v53_v56 }
  0x17   :  { %256 = vmatpush.xpose.msra.mxu2 %v617_v33  ;;  %v210_v48 = vsub.f32 %v721_v23, %v209_v36 }
  0x18   :  { %v216_v61 = vsub.f32 %v742_v41, %v215_v52  ;;  %v783_v11 = vsub.f32 %v53_v56, %v773_v0 }
  0x19   :  { %164 = vmatpush.xpose.msra.mxu1 %v163_v44  ;;  %111 = vmatpush.xpose.msra.mxu0 %v608_v28  ;;  %v744_v44 = vand.u32 4294901760, %v59_v31 }
  0x1a   :  { %307 = vmatpush.xpose.msra.mxu3 %v608_v28  ;;  %v217_v4 = vand.u32 4294901760, %v216_v61 }
  0x1b   :  { %259 = vmatpush.xpose.msra.mxu2 %v633_v40  ;;  %v758_v54 = vsub.f32 %v59_v31, %v744_v44 }
  0x1d   :  { %170 = vmatpush.xpose.msra.mxu1 %v169_v51  ;;  %113 = vmatpush.xpose.msra.mxu0 %v624_v35  ;;  %v205_v51 = vand.u32 4294901760, %v204_v38  ;;  %v221_v62 = vand.u32 4294901760, %v758_v54 }
  0x1e   :  { %309 = vmatpush.xpose.msra.mxu3 %v624_v35 }
  0x1f   :  { %262 = vmatpush.xpose.msra.mxu2 %v641_v42  ;;  %v222_v5 = vsub.f32 %v758_v54, %v221_v62 }
  0x21   :  { %176 = vmatpush.xpose.msra.mxu1 %v175_v58  ;;  %115 = vmatpush.xpose.msra.mxu0 %v643_v43  ;;  %v211_v58 = vand.u32 4294901760, %v210_v48  ;;  %v223_v21 = vand.u32 4294901760, %v222_v5 }
  0x22   :  { %311 = vmatpush.xpose.msra.mxu3 %v643_v43 }
  0x23   :  { %265 = vmatpush.xpose.msra.mxu2 %v658_v50 }
  0x25   :  { %182 = vmatpush.xpose.msra.mxu1 %v181_v63  ;;  %117 = vmatpush.xpose.msra.mxu0 %v664_v53  ;;  %v771_v63 = vsub.f32 %v56_v45, %v760_v55 }
  0x26   :  { %313 = vmatpush.xpose.msra.mxu3 %v664_v53 }
  0x27   :  { %268 = vmatpush.xpose.msra.mxu2 %v678_v59 }
  0x29   :  { %188 = vmatpush.xpose.msra.mxu1 %v187_v7  ;;  %119 = vmatpush.xpose.msra.mxu0 %v680_v60  ;;  %v227_v7 = vand.u32 4294901760, %v771_v63 }
  0x2a   :  { %315 = vmatpush.xpose.msra.mxu3 %v680_v60 }
  0x2b   :  { %271 = vmatpush.xpose.msra.mxu2 %v694_v2  ;;  %v228_v22 = vsub.f32 %v771_v63, %v227_v7 }
  0x2d   :  { %194 = vmatpush.xpose.msra.mxu1 %v193_v26  ;;  %121 = vmatpush.xpose.msra.mxu0 %v696_v3  ;;  %v233_v26 = vand.u32 4294901760, %v783_v11  ;;  %v229_v27 = vand.u32 4294901760, %v228_v22 }
  0x2e   :  { %317 = vmatpush.xpose.msra.mxu3 %v696_v3 }
  0x2f   :  { %274 = vmatpush.xpose.msra.mxu2 %v712_v17  ;;  %v234_v31 = vsub.f32 %v783_v11, %v233_v26 }
  0x31   :  { %200 = vmatpush.xpose.msra.mxu1 %v199_v37  ;;  %123 = vmatpush.xpose.msra.mxu0 %v704_v6  ;;  %v235_v34 = vand.u32 4294901760, %v234_v31 }
  0x32   :  { %319 = vmatpush.xpose.msra.mxu3 %v704_v6 }
  0x33   :  { %277 = vmatpush.xpose.msra.mxu2 %v721_v23 }
  0x35   :  { %206 = vmatpush.xpose.msra.mxu1 %v205_v51  ;;  %125 = vmatpush.xpose.msra.mxu0 %v728_v30 }
  0x36   :  { %321 = vmatpush.xpose.msra.mxu3 %v728_v30 }
  0x37   :  { %280 = vmatpush.xpose.msra.mxu2 %v742_v41 }
  0x39   :  { %212 = vmatpush.xpose.msra.mxu1 %v211_v58  ;;  %127 = vmatpush.xpose.msra.mxu0 %v744_v44 }
  0x3a   :  { %323 = vmatpush.xpose.msra.mxu3 %v744_v44 }
  0x3b   :  { %283 = vmatpush.xpose.msra.mxu2 %v758_v54 }
  0x3d   :  { %218 = vmatpush.xpose.msra.mxu1 %v217_v4  ;;  %129 = vmatpush.xpose.msra.mxu0 %v760_v55 }
  0x3e   :  { %325 = vmatpush.xpose.msra.mxu3 %v760_v55 }
  0x3f   :  { %286 = vmatpush.xpose.msra.mxu2 %v771_v63 }
  0x41   :  { %224 = vmatpush.xpose.msra.mxu1 %v223_v21  ;;  %131 = vmatpush.xpose.msra.mxu0 %v773_v0 }
  0x42   :  { %327 = vmatpush.xpose.msra.mxu3 %v773_v0 }
  0x43   :  { %289 = vmatpush.xpose.msra.mxu2 %v783_v11 }
  0x45   :  { %338 = vmatpush.xpose.msrb.mxu0 %v143_v18  ;;  %230 = vmatpush.xpose.msra.mxu1 %v229_v27 }
  0x49   :  { %342 = vmatpush.xpose.msrb.mxu0 %v149_v19  ;;  %236 = vmatpush.xpose.msra.mxu1 %v235_v34  ;;  %v507_v19 = vmov 0  }
  0x4a   :  { %480 = vset.pattern.permute.xlu0 %v507_v19 }
  0x4d   :  { %405 = vmatpush.xpose.msrb.mxu1 %v562_v8  ;;  %346 = vmatpush.xpose.msrb.mxu0 %v155_v24  ;;  %v132_v8 = vand.u32 4294901760, %v50_v14 }
  0x4f   :  { %238 = vmatmul.f32.vlgmr.msra.gmra.mxu1 %v132_v8 }
  0x51   :  { %407 = vmatpush.xpose.msrb.mxu1 %v564_v9  ;;  %350 = vmatpush.xpose.msrb.mxu0 %v161_v32  ;;  %v133_v9 = vsub.f32 %v50_v14, %v132_v8 }
  0x53   :  { %292 = vmatmul.f32.vlgmr.msra.gmra.mxu2 %v133_v9  ;;  %v134_v15 = vand.u32 4294901760, %v133_v9 }
  0x55   :  { %409 = vmatpush.xpose.msrb.mxu1 %v566_v10  ;;  %354 = vmatpush.xpose.msrb.mxu0 %v167_v39  ;;  %v135_v10 = vsub.f32 %v133_v9, %v134_v15 }
  0x56   :  { %331 = vmatmul.f32.vlgmr.msra.gmra.mxu3 %v134_v15 }
  0x57   :  { %v136_v18 = vand.u32 4294901760, %v135_v10 }
  0x59   :  { %411 = vmatpush.xpose.msrb.mxu1 %v569_v12  ;;  %358 = vmatpush.xpose.msrb.mxu0 %v173_v46  ;;  %v42_v12 = vld [vmem:[%s865_s2] sm:$0xff] }
  0x5a   :  { %137 = vmatmul.f32.vlgmr.msra.gmra.mxu0 %v136_v18  ;;  %45 = vperm.xlu0 %480, %v42_v12  }
  0x5d   :  { %413 = vmatpush.xpose.msrb.mxu1 %v589_v20  ;;  %362 = vmatpush.xpose.msrb.mxu0 %v179_v49  ;;  %v442_v20 = vld [vmem:[%s866_s3] sm:$0xff] }
  0x61   :  { %415 = vmatpush.xpose.msrb.mxu1 %v608_v28  ;;  %366 = vmatpush.xpose.msrb.mxu0 %v185_v57 }
  0x62   :  { %445 = vperm.xlu0 %480, %v442_v20  }
  0x65   :  { %417 = vmatpush.xpose.msrb.mxu1 %v624_v35  ;;  %370 = vmatpush.xpose.msrb.mxu0 %v191_v1  ;;  %v455_v1 = vld [vmem:[%s868_s5] sm:$0x1] }
  0x69   :  { %419 = vmatpush.xpose.msrb.mxu1 %v643_v43  ;;  %374 = vmatpush.xpose.msrb.mxu0 %v197_v16  ;;  %v458_v16 = vstv %s867_s4 }
  0x6d   :  { %421 = vmatpush.xpose.msrb.mxu1 %v664_v53  ;;  %378 = vmatpush.xpose.msrb.mxu0 %v203_v29 }
  0x71   :  { %423 = vmatpush.xpose.msrb.mxu1 %v680_v60  ;;  %382 = vmatpush.xpose.msrb.mxu0 %v209_v36 }
  0x75   :  { %425 = vmatpush.xpose.msrb.mxu1 %v696_v3  ;;  %386 = vmatpush.xpose.msrb.mxu0 %v215_v52 }
  0x79   :  { %427 = vmatpush.xpose.msrb.mxu1 %v704_v6  ;;  %390 = vmatpush.xpose.msrb.mxu0 %v221_v62  ;;  %v456_v6 = vmul.f32 0.1, %v455_v1 }
  0x7b   :  { %v459_v29 = vadd.f32 %v458_v16, %v456_v6 }
  0x7d   :  { %429 = vmatpush.xpose.msrb.mxu1 %v728_v30  ;;  %394 = vmatpush.xpose.msrb.mxu0 %v227_v7 }
  0x81   :  { %431 = vmatpush.xpose.msrb.mxu1 %v744_v44  ;;  %398 = vmatpush.xpose.msrb.mxu0 %v233_v26 }
  0x84   :  { %400 = vmatmul.f32.vlgmr.msrb.gmra.mxu0 %v132_v8 }
  0x85   :  { %433 = vmatpush.xpose.msrb.mxu1 %v760_v55 }
  0x89   :  { %435 = vmatpush.xpose.msrb.mxu1 %v773_v0 }
  0x8c   :  { %437 = vmatmul.f32.vlgmr.msrb.gmra.mxu1 %v132_v8 }
  0xcc   :  { %v46_v25 = vpop.permute.xlu0 %45  ;;  %v239_v32 = vpop.f32.mrf.mxu1 }
  0xd4   :  { %v446_v57 = vpop.permute.xlu0 %445 }
  0xd6   :  { %v293_v35 = vpop.f32.mrf.mxu2 }
  0xd7   :  { %v138_v24 = vpop.f32.mrf.mxu0 }
  0xd8   :  { %v139_v28 = vadd.f32 %v138_v24, %v46_v25 }
  0xd9   :  { %v332_v40 = vpop.f32.mrf.mxu3 }
  0xda   :  { %v240_v33 = vadd.f32 %v239_v32, %v139_v28 }
  0xdc   :  { %v294_v39 = vadd.f32 %v293_v35, %v240_v33 }
  0xde   :  { %v333_v42 = vadd.f32 %v332_v40, %v294_v39 }
 0x101   :  { %v401_v43 = vpop.f32.mrf.mxu0 }
 0x102   :  { %v402_v46 = vadd.f32 %v401_v43, %v333_v42 }
 0x109   :  { %v438_v49 = vpop.f32.mrf.mxu1 }
 0x10a   :  { %v439_v50 = vadd.f32 %v438_v49, %v402_v46 }
 0x10c   :  { %v441_v53 = vmax.f32 %v439_v50, 0.0 }
 0x10e   :  { %v448_v59 = vmul.f32 %v446_v57, %v441_v53 }
 0x110   :  { %v449_v60 = vrot.slane %v448_v59, 4 }
 0x112   :  { %v450_v2 = vadd.f32 %v449_v60, %v448_v59 }
 0x114   :  { %v451_v3 = vrot.slane %v450_v2, 2 }
 0x116   :  { %v452_v17 = vadd.f32 %v451_v3, %v450_v2 }
 0x118   :  { %v453_v23 = vrot.slane %v452_v17, 1 }
 0x11a   :  { %v454_v30 = vadd.f32 %v453_v23, %v452_v17 }
 0x11c   :  { %v460_v36 = vadd.f32 %v459_v29, %v454_v30 }
 0x11e   :  { %461 = vst [vmem:[#allocation3] sm:$0x1] %v460_v36 }
 0x11f   :  { %472 = dma.vmem_to_hbm [thread:$0]  %s468_s12, 16, %s470_s15, [#allocation4]  }
 0x120   :  { %505 = dma.done.wait [#allocation4], 16  }
 0x121   :  { %506 = vsyncadd [#allocation4], 4294967280 }
 0x122   :  { %477 = vsyncpa [#allocation4], 1 }

</bundles_post_ra>
